<compile_context>
chip_gen: v6e
topology: v6e:2x2x1
jax: 0.10.0
libtpu: 0.0.40
codegen_flags: <defaults>
</compile_context>

<pallas_src>
import functools
import math

import jax
import jax.numpy as jnp
import numpy as np
from jax.experimental import pallas as pl
from jax.experimental.pallas import tpu as pltpu


def _layernorm(x, g, b, eps=1e-5):
    mu = jnp.mean(x, axis=-1, keepdims=True)
    var = jnp.mean((x - mu) ** 2, axis=-1, keepdims=True)
    return (x - mu) * jax.lax.rsqrt(var + eps) * g + b


def _gelu_tanh(x):
    # PyTorch nn.GELU(approximate='tanh')
    c = 0.7978845608028654  # sqrt(2/pi)
    return 0.5 * x * (1.0 + jnp.tanh(c * (x + 0.044715 * x * x * x)))


def block_kernel(x_ref, g1_ref, b1_ref,
                 wqkv_ref, bqkv_ref, wproj_ref, bproj_ref,
                 g2_ref, b2_ref, wfc1_ref, bfc1_ref, wfc2_ref, bfc2_ref,
                 o_ref, *, n_head):
    x = x_ref[0]                                   # (T, C) f32, this batch element
    T, C = x.shape
    H = n_head
    hd = C // H
    scale = 1.0 / math.sqrt(hd)

    # ---- ln1 + multi-head causal attention (heads batched) -----------------
    h = _layernorm(x, g1_ref[...], b1_ref[...]).astype(jnp.bfloat16)   # (T, C)
    hb = jnp.broadcast_to(h, (H, T, C))            # shared lhs, broadcast once

    # Fused QKV: (H,T,C) x (H,C,3*hd) -> (H,T,3*hd); bf16 operands, f32 accumulation.
    qkv = jnp.einsum('htc,hce->hte', hb, wqkv_ref[...],
                     preferred_element_type=jnp.float32) + bqkv_ref[...]

    # static lane slices; fold 1/sqrt(hd) into q (cheaper than scaling (H,T,T) scores)
    q = (qkv[..., 0:hd] * scale).astype(jnp.bfloat16)        # (H, T, hd)
    k = qkv[..., hd:2 * hd].astype(jnp.bfloat16)             # (H, T, hd)
    v = qkv[..., 2 * hd:3 * hd].astype(jnp.bfloat16)         # (H, T, hd)

    # additive causal bias, built once per grid step (shared across all heads)
    row = jax.lax.broadcasted_iota(jnp.int32, (T, T), 0)
    col = jax.lax.broadcasted_iota(jnp.int32, (T, T), 1)
    mask_bias = jnp.where(col <= row, jnp.float32(0.0), jnp.float32(-1e30))

    # scores / softmax, all heads at once
    s = jnp.einsum('htd,hsd->hts', q, k,
                   preferred_element_type=jnp.float32) + mask_bias[None, :, :]
    m = jnp.max(s, axis=-1, keepdims=True)
    p = jnp.exp(s - m)
    inv_l = pl.reciprocal(jnp.sum(p, axis=-1, keepdims=True), approx=True)  # EUP

    # context, softmax normalization folded in after the matmul
    ctx = jnp.einsum('hts,hsd->htd', p.astype(jnp.bfloat16), v,
                     preferred_element_type=jnp.float32) * inv_l            # (H,T,hd)

    # output projection folded into the head-batched contraction (no concat)
    proj = jnp.einsum('htd,hdc->htc', ctx.astype(jnp.bfloat16), wproj_ref[...],
                      preferred_element_type=jnp.float32)                   # (H,T,C)
    attn = jnp.sum(proj, axis=0) + bproj_ref[...]                           # (T, C)

    x1 = x + attn                                                            # residual 1

    # ---- ln2 + MLP ----------------------------------------------------------
    h2 = _layernorm(x1, g2_ref[...], b2_ref[...]).astype(jnp.bfloat16)
    f = jnp.dot(h2, wfc1_ref[...], preferred_element_type=jnp.float32) + bfc1_ref[...]
    f = _gelu_tanh(f).astype(jnp.bfloat16)
    mlp = jnp.dot(f, wfc2_ref[...], preferred_element_type=jnp.float32) + bfc2_ref[...]

    o_ref[0] = (x1 + mlp).astype(o_ref.dtype)                                # residual 2


def transformer_block(x, params, n_head):
    B, T, C = x.shape
    (g1, b1, wqkv, bqkv, wproj, bproj, g2, b2, wfc1, bfc1, wfc2, bfc2) = params
    H = n_head
    assert C % H == 0
    hd = C // H

    # ---- layout plumbing done once in the wrapper, outside the kernel ------
    # qkv weight columns are ordered (3, H, hd) (PyTorch reshape order);
    # regroup per head to (H, C, 3*hd) so the kernel does one fused QKV einsum
    # and slices q/k/v out of a contiguous 3*hd lane block.
    wqkv_h = (wqkv.reshape(C, 3, H, hd)
                   .transpose(2, 0, 1, 3)           # (H, C, 3, hd)
                   .reshape(H, C, 3 * hd)
                   .astype(jnp.bfloat16))
    bqkv_h = (bqkv.reshape(3, H, hd)
                   .transpose(1, 0, 2)               # (H, 3, hd)
                   .reshape(H, 1, 3 * hd))           # f32 bias
    wproj_h = wproj.reshape(H, hd, C).astype(jnp.bfloat16)      # (H, hd, C)
    wfc1_b = wfc1.astype(jnp.bfloat16)
    wfc2_b = wfc2.astype(jnp.bfloat16)

    kernel = functools.partial(block_kernel, n_head=n_head)
    full2 = lambda b: (0, 0)
    full3 = lambda b: (0, 0, 0)

    # advisory cost so XLA schedules around this long fused call
    cost = pl.CostEstimate(
        flops=int(B * (24 * T * C * C + 4 * T * T * C)),
        transcendentals=int(B * (H * T * T + 4 * T * C + H * T + 2 * T)),
        bytes_accessed=int(2 * B * T * C * 4 + 12 * C * C * 2 + 16 * C * 4),
    )

    # TODO(synk): for long T / large C, add flash-style q/kv sequence tiling and
    #             single-buffer the constant weight operands so the working set
    #             fits v7x's 64 MiB VMEM; not needed at these shapes.
    return pl.pallas_call(
        kernel,
        out_shape=jax.ShapeDtypeStruct((B, T, C), x.dtype),
        grid_spec=pltpu.PrefetchScalarGridSpec(
            num_scalar_prefetch=0,
            grid=(B,),
            in_specs=[
                pl.BlockSpec((1, T, C), lambda b: (b, 0, 0)),   # x
                pl.BlockSpec((1, C), full2),                    # ln1 gamma
                pl.BlockSpec((1, C), full2),                    # ln1 beta
                pl.BlockSpec((H, C, 3 * hd), full3),            # fused W_qkv (per head)
                pl.BlockSpec((H, 1, 3 * hd), full3),            # fused b_qkv (per head)
                pl.BlockSpec((H, hd, C), full3),                # W_proj (per head)
                pl.BlockSpec((1, C), full2),                    # b_proj
                pl.BlockSpec((1, C), full2),                    # ln2 gamma
                pl.BlockSpec((1, C), full2),                    # ln2 beta
                pl.BlockSpec((C, 4 * C), full2),                # W_fc1
                pl.BlockSpec((1, 4 * C), full2),                # b_fc1
                pl.BlockSpec((4 * C, C), full2),                # W_fc2
                pl.BlockSpec((1, C), full2),                    # b_fc2
            ],
            out_specs=pl.BlockSpec((1, T, C), lambda b: (b, 0, 0)),
        ),
        compiler_params=pltpu.CompilerParams(
            dimension_semantics=("parallel",),        # batch elems independent -> both TCs busy
            vmem_limit_bytes=64 * 1024 * 1024,
        ),
        cost_estimate=cost,
    )(x, g1, b1, wqkv_h, bqkv_h, wproj_h, bproj, g2, b2,
      wfc1_b, bfc1, wfc2_b, bfc2)


# ---- pure-JAX (f32) reference for verification ------------------------------
def reference_block(x, params, n_head):
    (g1, b1, wqkv, bqkv, wproj, bproj, g2, b2, wfc1, bfc1, wfc2, bfc2) = params
    B, T, C = x.shape
    hd = C // n_head

    def ln(t, g, b):
        mu = jnp.mean(t, axis=-1, keepdims=True)
        var = jnp.mean((t - mu) ** 2, axis=-1, keepdims=True)
        return (t - mu) / jnp.sqrt(var + 1e-5) * g + b

    h = ln(x, g1, b1)
    qkv = h @ wqkv + bqkv
    q, k, v = jnp.split(qkv, 3, axis=-1)
    q = q.reshape(B, T, n_head, hd).transpose(0, 2, 1, 3)
    k = k.reshape(B, T, n_head, hd).transpose(0, 2, 1, 3)
    v = v.reshape(B, T, n_head, hd).transpose(0, 2, 1, 3)
    s = jnp.einsum("bhqd,bhkd->bhqk", q, k) / math.sqrt(hd)
    mask = jnp.tril(jnp.ones((T, T), dtype=bool))
    s = jnp.where(mask, s, -jnp.inf)
    p = jax.nn.softmax(s, axis=-1)
    y = jnp.einsum("bhqk,bhkd->bhqd", p, v).transpose(0, 2, 1, 3).reshape(B, T, C)
    x1 = x + (y @ wproj + bproj)
    h2 = ln(x1, g2, b2)
    f = jax.nn.gelu(h2 @ wfc1 + bfc1, approximate=True)
    return x1 + (f @ wfc2 + bfc2)


if __name__ == "__main__":
    # small shapes consistent with the module: B=2, T=8, n_embed=32, n_head=4
    B, T, C, n_head = 2, 8, 32, 4

    key = jax.random.PRNGKey(0)
    ks = jax.random.split(key, 8)
    std = 0.02
    x = jax.random.normal(ks[0], (B, T, C), dtype=jnp.float32)

    g1 = jnp.ones((1, C), jnp.float32)
    b1 = jnp.zeros((1, C), jnp.float32)
    wqkv = std * jax.random.normal(ks[1], (C, 3 * C), dtype=jnp.float32)
    bqkv = std * jax.random.normal(ks[2], (1, 3 * C), dtype=jnp.float32)
    wproj = std * jax.random.normal(ks[3], (C, C), dtype=jnp.float32)
    bproj = std * jax.random.normal(ks[4], (1, C), dtype=jnp.float32)
    g2 = jnp.ones((1, C), jnp.float32)
    b2 = jnp.zeros((1, C), jnp.float32)
    wfc1 = std * jax.random.normal(ks[5], (C, 4 * C), dtype=jnp.float32)
    bfc1 = std * jax.random.normal(ks[6], (1, 4 * C), dtype=jnp.float32)
    wfc2 = std * jax.random.normal(ks[7], (4 * C, C), dtype=jnp.float32)
    bfc2 = jnp.zeros((1, C), jnp.float32)

    params = (g1, b1, wqkv, bqkv, wproj, bproj, g2, b2, wfc1, bfc1, wfc2, bfc2)

    out = transformer_block(x, params, n_head)
    out = jax.block_until_ready(out)

    ref = reference_block(x, params, n_head)
    # kernel runs its matmuls in bf16 (f32 accumulation) -> compare with bf16-level tolerance
    np.testing.assert_allclose(np.asarray(out), np.asarray(ref), rtol=2e-2, atol=2e-2)

    print("KERNEL_OK")
</pallas_src>

<mosaic_0001>
module attributes {stable_mosaic.version = 11 : i64} {
  func.func @block_kernel(%arg0: i32, %arg1: memref<1x8x32xf32, #tpu.memory_space<vmem>>, %arg2: memref<1x32xf32, #tpu.memory_space<vmem>>, %arg3: memref<1x32xf32, #tpu.memory_space<vmem>>, %arg4: memref<4x32x24xbf16, #tpu.memory_space<vmem>>, %arg5: memref<4x1x24xf32, #tpu.memory_space<vmem>>, %arg6: memref<4x8x32xbf16, #tpu.memory_space<vmem>>, %arg7: memref<1x32xf32, #tpu.memory_space<vmem>>, %arg8: memref<1x32xf32, #tpu.memory_space<vmem>>, %arg9: memref<1x32xf32, #tpu.memory_space<vmem>>, %arg10: memref<32x128xbf16, #tpu.memory_space<vmem>>, %arg11: memref<1x128xf32, #tpu.memory_space<vmem>>, %arg12: memref<128x32xbf16, #tpu.memory_space<vmem>>, %arg13: memref<1x32xf32, #tpu.memory_space<vmem>>, %arg14: memref<1x8x32xf32, #tpu.memory_space<vmem>>) attributes {dimension_semantics = [#tpu.dimension_semantics<parallel>], iteration_bounds = array<i64: 2>, scalar_prefetch = 0 : i64, scratch_operands = 0 : i64, tpu.core_type = #tpu.core_type<tc>, window_params = [{transform_indices = @transform_0, window_bounds = array<i64: 1, 8, 32>}, {pipeline_mode = #tpu.pipeline_mode<synchronous>, transform_indices = @transform_1, window_bounds = array<i64: 1, 32>}, {pipeline_mode = #tpu.pipeline_mode<synchronous>, transform_indices = @transform_2, window_bounds = array<i64: 1, 32>}, {pipeline_mode = #tpu.pipeline_mode<synchronous>, transform_indices = @transform_3, window_bounds = array<i64: 4, 32, 24>}, {pipeline_mode = #tpu.pipeline_mode<synchronous>, transform_indices = @transform_4, window_bounds = array<i64: 4, 1, 24>}, {pipeline_mode = #tpu.pipeline_mode<synchronous>, transform_indices = @transform_5, window_bounds = array<i64: 4, 8, 32>}, {pipeline_mode = #tpu.pipeline_mode<synchronous>, transform_indices = @transform_6, window_bounds = array<i64: 1, 32>}, {pipeline_mode = #tpu.pipeline_mode<synchronous>, transform_indices = @transform_7, window_bounds = array<i64: 1, 32>}, {pipeline_mode = #tpu.pipeline_mode<synchronous>, transform_indices = @transform_8, window_bounds = array<i64: 1, 32>}, {pipeline_mode = #tpu.pipeline_mode<synchronous>, transform_indices = @transform_9, window_bounds = array<i64: 32, 128>}, {pipeline_mode = #tpu.pipeline_mode<synchronous>, transform_indices = @transform_10, window_bounds = array<i64: 1, 128>}, {pipeline_mode = #tpu.pipeline_mode<synchronous>, transform_indices = @transform_11, window_bounds = array<i64: 128, 32>}, {pipeline_mode = #tpu.pipeline_mode<synchronous>, transform_indices = @transform_12, window_bounds = array<i64: 1, 32>}, {transform_indices = @transform_13, window_bounds = array<i64: 1, 8, 32>}]} {
    %c0 = arith.constant 0 : index
    %c0_0 = arith.constant 0 : index
    %c0_1 = arith.constant 0 : index
    %0 = vector.load %arg1[%c0, %c0_0, %c0_1] : memref<1x8x32xf32, #tpu.memory_space<vmem>>, vector<1x8x32xf32>
    %1 = vector.shape_cast %0 : vector<1x8x32xf32> to vector<8x32xf32>
    %c0_2 = arith.constant 0 : index
    %c0_3 = arith.constant 0 : index
    %2 = vector.load %arg2[%c0_2, %c0_3] : memref<1x32xf32, #tpu.memory_space<vmem>>, vector<1x32xf32>
    %c0_4 = arith.constant 0 : index
    %c0_5 = arith.constant 0 : index
    %3 = vector.load %arg3[%c0_4, %c0_5] : memref<1x32xf32, #tpu.memory_space<vmem>>, vector<1x32xf32>
    %cst = arith.constant dense<0.000000e+00> : vector<8xf32>
    %4 = vector.multi_reduction <add>, %1, %cst [1] : vector<8x32xf32> to vector<8xf32>
    %5 = vector.shape_cast %4 : vector<8xf32> to vector<8x1xf32>
    %cst_6 = arith.constant 3.200000e+01 : f32
    %6 = vector.broadcast %cst_6 : f32 to vector<8x1xf32>
    %7 = arith.divf %5, %6 : vector<8x1xf32>
    %8 = vector.broadcast %7 : vector<8x1xf32> to vector<8x32xf32>
    %9 = arith.subf %1, %8 : vector<8x32xf32>
    %10 = arith.mulf %9, %9 : vector<8x32xf32>
    %cst_7 = arith.constant dense<0.000000e+00> : vector<8xf32>
    %11 = vector.multi_reduction <add>, %10, %cst_7 [1] : vector<8x32xf32> to vector<8xf32>
    %12 = vector.shape_cast %11 : vector<8xf32> to vector<8x1xf32>
    %cst_8 = arith.constant 3.200000e+01 : f32
    %13 = vector.broadcast %cst_8 : f32 to vector<8x1xf32>
    %14 = arith.divf %12, %13 : vector<8x1xf32>
    %15 = vector.broadcast %7 : vector<8x1xf32> to vector<8x32xf32>
    %16 = arith.subf %1, %15 : vector<8x32xf32>
    %cst_9 = arith.constant 9.99999974E-6 : f32
    %17 = vector.broadcast %cst_9 : f32 to vector<8x1xf32>
    %18 = arith.addf %14, %17 : vector<8x1xf32>
    %19 = math.rsqrt %18 : vector<8x1xf32>
    %20 = vector.broadcast %19 : vector<8x1xf32> to vector<8x32xf32>
    %21 = arith.mulf %16, %20 : vector<8x32xf32>
    %22 = vector.broadcast %2 : vector<1x32xf32> to vector<8x32xf32>
    %23 = arith.mulf %21, %22 : vector<8x32xf32>
    %24 = vector.broadcast %3 : vector<1x32xf32> to vector<8x32xf32>
    %25 = arith.addf %23, %24 : vector<8x32xf32>
    %26 = arith.truncf %25 : vector<8x32xf32> to vector<8x32xbf16>
    %27 = vector.shape_cast %26 : vector<8x32xbf16> to vector<1x8x32xbf16>
    %28 = vector.broadcast %27 : vector<1x8x32xbf16> to vector<4x8x32xbf16>
    %c0_10 = arith.constant 0 : index
    %c0_11 = arith.constant 0 : index
    %c0_12 = arith.constant 0 : index
    %29 = vector.load %arg4[%c0_10, %c0_11, %c0_12] : memref<4x32x24xbf16, #tpu.memory_space<vmem>>, vector<4x32x24xbf16>
    "tpu.trace_start"() <{level = 10 : i32, message = "htc,hce->hte"}> : () -> ()
    %cst_13 = arith.constant dense<0.000000e+00> : vector<4x8x24xf32>
    %30 = tpu.matmul %28, %29, %cst_13 {dimension_numbers = #tpu.dot_dimension_numbers<[2], [1], [1], [2], [0, 0, 0, 1, 1, 2], [0], [0]>} : vector<4x8x32xbf16>, vector<4x32x24xbf16>, vector<4x8x24xf32> -> vector<4x8x24xf32>
    "tpu.trace_stop"() : () -> ()
    %c0_14 = arith.constant 0 : index
    %c0_15 = arith.constant 0 : index
    %c0_16 = arith.constant 0 : index
    %31 = vector.load %arg5[%c0_14, %c0_15, %c0_16] : memref<4x1x24xf32, #tpu.memory_space<vmem>>, vector<4x1x24xf32>
    %32 = vector.broadcast %31 : vector<4x1x24xf32> to vector<4x8x24xf32>
    %33 = arith.addf %30, %32 : vector<4x8x24xf32>
    %34 = vector.extract_strided_slice %33 {offsets = [0, 0, 0], sizes = [4, 8, 8], strides = [1, 1, 1]} : vector<4x8x24xf32> to vector<4x8x8xf32>
    %cst_17 = arith.constant 0.353553385 : f32
    %35 = vector.broadcast %cst_17 : f32 to vector<4x8x8xf32>
    %36 = arith.mulf %34, %35 : vector<4x8x8xf32>
    %37 = arith.truncf %36 : vector<4x8x8xf32> to vector<4x8x8xbf16>
    %38 = vector.extract_strided_slice %33 {offsets = [0, 0, 8], sizes = [4, 8, 8], strides = [1, 1, 1]} : vector<4x8x24xf32> to vector<4x8x8xf32>
    %39 = arith.truncf %38 : vector<4x8x8xf32> to vector<4x8x8xbf16>
    %40 = vector.extract_strided_slice %33 {offsets = [0, 0, 16], sizes = [4, 8, 8], strides = [1, 1, 1]} : vector<4x8x24xf32> to vector<4x8x8xf32>
    %41 = arith.truncf %40 : vector<4x8x8xf32> to vector<4x8x8xbf16>
    %42 = tpu.iota {dimensions = array<i32: 0>} : vector<8x8xi32>
    %43 = tpu.iota {dimensions = array<i32: 1>} : vector<8x8xi32>
    %44 = arith.cmpi sle, %43, %42 : vector<8x8xi32>
    %cst_18 = arith.constant 0.000000e+00 : f32
    %cst_19 = arith.constant -1.000000e+30 : f32
    %45 = vector.broadcast %cst_18 : f32 to vector<8x8xf32>
    %46 = vector.broadcast %cst_19 : f32 to vector<8x8xf32>
    %47 = arith.select %44, %45, %46 : vector<8x8xi1>, vector<8x8xf32>
    "tpu.trace_start"() <{level = 10 : i32, message = "htd,hsd->hts"}> : () -> ()
    %cst_20 = arith.constant dense<0.000000e+00> : vector<4x8x8xf32>
    %48 = tpu.matmul %37, %39, %cst_20 {dimension_numbers = #tpu.dot_dimension_numbers<[2], [2], [1], [1], [0, 0, 0, 1, 1, 1], [0], [0]>} : vector<4x8x8xbf16>, vector<4x8x8xbf16>, vector<4x8x8xf32> -> vector<4x8x8xf32>
    "tpu.trace_stop"() : () -> ()
    %49 = vector.shape_cast %47 : vector<8x8xf32> to vector<1x8x8xf32>
    %50 = vector.broadcast %49 : vector<1x8x8xf32> to vector<4x8x8xf32>
    %51 = arith.addf %48, %50 : vector<4x8x8xf32>
    %cst_21 = arith.constant dense<0xFF800000> : vector<4x8xf32>
    %52 = vector.multi_reduction <maximumf>, %51, %cst_21 [2] : vector<4x8x8xf32> to vector<4x8xf32>
    %53 = vector.shape_cast %52 : vector<4x8xf32> to vector<4x8x1xf32>
    %54 = vector.broadcast %53 : vector<4x8x1xf32> to vector<4x8x8xf32>
    %55 = arith.subf %51, %54 : vector<4x8x8xf32>
    %56 = math.exp %55 : vector<4x8x8xf32>
    %cst_22 = arith.constant dense<0.000000e+00> : vector<4x8xf32>
    %57 = vector.multi_reduction <add>, %56, %cst_22 [2] : vector<4x8x8xf32> to vector<4x8xf32>
    %58 = vector.shape_cast %57 : vector<4x8xf32> to vector<4x8x1xf32>
    %59 = tpu.reciprocal %58 {approx = true} : vector<4x8x1xf32> -> vector<4x8x1xf32>
    %60 = arith.truncf %56 : vector<4x8x8xf32> to vector<4x8x8xbf16>
    "tpu.trace_start"() <{level = 10 : i32, message = "hts,hsd->htd"}> : () -> ()
    %cst_23 = arith.constant dense<0.000000e+00> : vector<4x8x8xf32>
    %61 = tpu.matmul %60, %41, %cst_23 {dimension_numbers = #tpu.dot_dimension_numbers<[2], [1], [1], [2], [0, 0, 0, 1, 1, 2], [0], [0]>} : vector<4x8x8xbf16>, vector<4x8x8xbf16>, vector<4x8x8xf32> -> vector<4x8x8xf32>
    "tpu.trace_stop"() : () -> ()
    %62 = vector.broadcast %59 : vector<4x8x1xf32> to vector<4x8x8xf32>
    %63 = arith.mulf %61, %62 : vector<4x8x8xf32>
    %64 = arith.truncf %63 : vector<4x8x8xf32> to vector<4x8x8xbf16>
    %c0_24 = arith.constant 0 : index
    %c0_25 = arith.constant 0 : index
    %c0_26 = arith.constant 0 : index
    %65 = vector.load %arg6[%c0_24, %c0_25, %c0_26] : memref<4x8x32xbf16, #tpu.memory_space<vmem>>, vector<4x8x32xbf16>
    "tpu.trace_start"() <{level = 10 : i32, message = "htd,hdc->htc"}> : () -> ()
    %cst_27 = arith.constant dense<0.000000e+00> : vector<4x8x32xf32>
    %66 = tpu.matmul %64, %65, %cst_27 {dimension_numbers = #tpu.dot_dimension_numbers<[2], [1], [1], [2], [0, 0, 0, 1, 1, 2], [0], [0]>} : vector<4x8x8xbf16>, vector<4x8x32xbf16>, vector<4x8x32xf32> -> vector<4x8x32xf32>
    "tpu.trace_stop"() : () -> ()
    %cst_28 = arith.constant dense<0.000000e+00> : vector<8x32xf32>
    %67 = vector.multi_reduction <add>, %66, %cst_28 [0] : vector<4x8x32xf32> to vector<8x32xf32>
    %c0_29 = arith.constant 0 : index
    %c0_30 = arith.constant 0 : index
    %68 = vector.load %arg7[%c0_29, %c0_30] : memref<1x32xf32, #tpu.memory_space<vmem>>, vector<1x32xf32>
    %69 = vector.broadcast %68 : vector<1x32xf32> to vector<8x32xf32>
    %70 = arith.addf %67, %69 : vector<8x32xf32>
    %71 = arith.addf %1, %70 : vector<8x32xf32>
    %c0_31 = arith.constant 0 : index
    %c0_32 = arith.constant 0 : index
    %72 = vector.load %arg8[%c0_31, %c0_32] : memref<1x32xf32, #tpu.memory_space<vmem>>, vector<1x32xf32>
    %c0_33 = arith.constant 0 : index
    %c0_34 = arith.constant 0 : index
    %73 = vector.load %arg9[%c0_33, %c0_34] : memref<1x32xf32, #tpu.memory_space<vmem>>, vector<1x32xf32>
    %cst_35 = arith.constant dense<0.000000e+00> : vector<8xf32>
    %74 = vector.multi_reduction <add>, %71, %cst_35 [1] : vector<8x32xf32> to vector<8xf32>
    %75 = vector.shape_cast %74 : vector<8xf32> to vector<8x1xf32>
    %cst_36 = arith.constant 3.200000e+01 : f32
    %76 = vector.broadcast %cst_36 : f32 to vector<8x1xf32>
    %77 = arith.divf %75, %76 : vector<8x1xf32>
    %78 = vector.broadcast %77 : vector<8x1xf32> to vector<8x32xf32>
    %79 = arith.subf %71, %78 : vector<8x32xf32>
    %80 = arith.mulf %79, %79 : vector<8x32xf32>
    %cst_37 = arith.constant dense<0.000000e+00> : vector<8xf32>
    %81 = vector.multi_reduction <add>, %80, %cst_37 [1] : vector<8x32xf32> to vector<8xf32>
    %82 = vector.shape_cast %81 : vector<8xf32> to vector<8x1xf32>
    %cst_38 = arith.constant 3.200000e+01 : f32
    %83 = vector.broadcast %cst_38 : f32 to vector<8x1xf32>
    %84 = arith.divf %82, %83 : vector<8x1xf32>
    %85 = vector.broadcast %77 : vector<8x1xf32> to vector<8x32xf32>
    %86 = arith.subf %71, %85 : vector<8x32xf32>
    %cst_39 = arith.constant 9.99999974E-6 : f32
    %87 = vector.broadcast %cst_39 : f32 to vector<8x1xf32>
    %88 = arith.addf %84, %87 : vector<8x1xf32>
    %89 = math.rsqrt %88 : vector<8x1xf32>
    %90 = vector.broadcast %89 : vector<8x1xf32> to vector<8x32xf32>
    %91 = arith.mulf %86, %90 : vector<8x32xf32>
    %92 = vector.broadcast %72 : vector<1x32xf32> to vector<8x32xf32>
    %93 = arith.mulf %91, %92 : vector<8x32xf32>
    %94 = vector.broadcast %73 : vector<1x32xf32> to vector<8x32xf32>
    %95 = arith.addf %93, %94 : vector<8x32xf32>
    %96 = arith.truncf %95 : vector<8x32xf32> to vector<8x32xbf16>
    %c0_40 = arith.constant 0 : index
    %c0_41 = arith.constant 0 : index
    %97 = vector.load %arg10[%c0_40, %c0_41] : memref<32x128xbf16, #tpu.memory_space<vmem>>, vector<32x128xbf16>
    %cst_42 = arith.constant dense<0.000000e+00> : vector<8x128xf32>
    %98 = tpu.matmul %96, %97, %cst_42 {dimension_numbers = #tpu.dot_dimension_numbers<[1], [0], [0], [1], [0, 0, 1, 1], [], []>} : vector<8x32xbf16>, vector<32x128xbf16>, vector<8x128xf32> -> vector<8x128xf32>
    %c0_43 = arith.constant 0 : index
    %c0_44 = arith.constant 0 : index
    %99 = vector.load %arg11[%c0_43, %c0_44] : memref<1x128xf32, #tpu.memory_space<vmem>>, vector<1x128xf32>
    %100 = vector.broadcast %99 : vector<1x128xf32> to vector<8x128xf32>
    %101 = arith.addf %98, %100 : vector<8x128xf32>
    %cst_45 = arith.constant 5.000000e-01 : f32
    %102 = vector.broadcast %cst_45 : f32 to vector<8x128xf32>
    %103 = arith.mulf %102, %101 : vector<8x128xf32>
    %cst_46 = arith.constant 4.471500e-02 : f32
    %104 = vector.broadcast %cst_46 : f32 to vector<8x128xf32>
    %105 = arith.mulf %104, %101 : vector<8x128xf32>
    %106 = arith.mulf %105, %101 : vector<8x128xf32>
    %107 = arith.mulf %106, %101 : vector<8x128xf32>
    %108 = arith.addf %101, %107 : vector<8x128xf32>
    %cst_47 = arith.constant 0.797884583 : f32
    %109 = vector.broadcast %cst_47 : f32 to vector<8x128xf32>
    %110 = arith.mulf %109, %108 : vector<8x128xf32>
    %111 = math.tanh %110 : vector<8x128xf32>
    %cst_48 = arith.constant 1.000000e+00 : f32
    %112 = vector.broadcast %cst_48 : f32 to vector<8x128xf32>
    %113 = arith.addf %112, %111 : vector<8x128xf32>
    %114 = arith.mulf %103, %113 : vector<8x128xf32>
    %115 = arith.truncf %114 : vector<8x128xf32> to vector<8x128xbf16>
    %c0_49 = arith.constant 0 : index
    %c0_50 = arith.constant 0 : index
    %116 = vector.load %arg12[%c0_49, %c0_50] : memref<128x32xbf16, #tpu.memory_space<vmem>>, vector<128x32xbf16>
    %cst_51 = arith.constant dense<0.000000e+00> : vector<8x32xf32>
    %117 = tpu.matmul %115, %116, %cst_51 {dimension_numbers = #tpu.dot_dimension_numbers<[1], [0], [0], [1], [0, 0, 1, 1], [], []>} : vector<8x128xbf16>, vector<128x32xbf16>, vector<8x32xf32> -> vector<8x32xf32>
    %c0_52 = arith.constant 0 : index
    %c0_53 = arith.constant 0 : index
    %118 = vector.load %arg13[%c0_52, %c0_53] : memref<1x32xf32, #tpu.memory_space<vmem>>, vector<1x32xf32>
    %119 = vector.broadcast %118 : vector<1x32xf32> to vector<8x32xf32>
    %120 = arith.addf %117, %119 : vector<8x32xf32>
    %121 = arith.addf %71, %120 : vector<8x32xf32>
    %c0_54 = arith.constant 0 : index
    %c0_55 = arith.constant 0 : index
    %c0_56 = arith.constant 0 : index
    %122 = vector.load %arg14[%c0_54, %c0_55, %c0_56] : memref<1x8x32xf32, #tpu.memory_space<vmem>>, vector<1x8x32xf32>
    %123 = vector.shape_cast %122 : vector<1x8x32xf32> to vector<8x32xf32>
    %124 = vector.shape_cast %121 : vector<8x32xf32> to vector<1x8x32xf32>
    tpu.vector_store %arg14[%c0_54, %c0_55, %c0_56], %124 {strides = array<i32>} : memref<1x8x32xf32, #tpu.memory_space<vmem>>, vector<1x8x32xf32>,
    return
  }
  func.func @transform_0(%arg0: i32) -> (i32, i32, i32) {
    %c0_i32 = arith.constant 0 : i32
    %c0_i32_0 = arith.constant 0 : i32
    %c0_i32_1 = arith.constant 0 : i32
    return %arg0, %c0_i32, %c0_i32_0 : i32, i32, i32
  }
  func.func @transform_1(%arg0: i32) -> (i32, i32) {
    %c0_i32 = arith.constant 0 : i32
    %c0_i32_0 = arith.constant 0 : i32
    %c0_i32_1 = arith.constant 0 : i32
    return %c0_i32, %c0_i32_0 : i32, i32
  }
  func.func @transform_2(%arg0: i32) -> (i32, i32) {
    %c0_i32 = arith.constant 0 : i32
    %c0_i32_0 = arith.constant 0 : i32
    %c0_i32_1 = arith.constant 0 : i32
    return %c0_i32, %c0_i32_0 : i32, i32
  }
  func.func @transform_3(%arg0: i32) -> (i32, i32, i32) {
    %c0_i32 = arith.constant 0 : i32
    %c0_i32_0 = arith.constant 0 : i32
    %c0_i32_1 = arith.constant 0 : i32
    %c0_i32_2 = arith.constant 0 : i32
    return %c0_i32, %c0_i32_0, %c0_i32_1 : i32, i32, i32
  }
  func.func @transform_4(%arg0: i32) -> (i32, i32, i32) {
    %c0_i32 = arith.constant 0 : i32
    %c0_i32_0 = arith.constant 0 : i32
    %c0_i32_1 = arith.constant 0 : i32
    %c0_i32_2 = arith.constant 0 : i32
    return %c0_i32, %c0_i32_0, %c0_i32_1 : i32, i32, i32
  }
  func.func @transform_5(%arg0: i32) -> (i32, i32, i32) {
    %c0_i32 = arith.constant 0 : i32
    %c0_i32_0 = arith.constant 0 : i32
    %c0_i32_1 = arith.constant 0 : i32
    %c0_i32_2 = arith.constant 0 : i32
    return %c0_i32, %c0_i32_0, %c0_i32_1 : i32, i32, i32
  }
  func.func @transform_6(%arg0: i32) -> (i32, i32) {
    %c0_i32 = arith.constant 0 : i32
    %c0_i32_0 = arith.constant 0 : i32
    %c0_i32_1 = arith.constant 0 : i32
    return %c0_i32, %c0_i32_0 : i32, i32
  }
  func.func @transform_7(%arg0: i32) -> (i32, i32) {
    %c0_i32 = arith.constant 0 : i32
    %c0_i32_0 = arith.constant 0 : i32
    %c0_i32_1 = arith.constant 0 : i32
    return %c0_i32, %c0_i32_0 : i32, i32
  }
  func.func @transform_8(%arg0: i32) -> (i32, i32) {
    %c0_i32 = arith.constant 0 : i32
    %c0_i32_0 = arith.constant 0 : i32
    %c0_i32_1 = arith.constant 0 : i32
    return %c0_i32, %c0_i32_0 : i32, i32
  }
  func.func @transform_9(%arg0: i32) -> (i32, i32) {
    %c0_i32 = arith.constant 0 : i32
    %c0_i32_0 = arith.constant 0 : i32
    %c0_i32_1 = arith.constant 0 : i32
    return %c0_i32, %c0_i32_0 : i32, i32
  }
  func.func @transform_10(%arg0: i32) -> (i32, i32) {
    %c0_i32 = arith.constant 0 : i32
    %c0_i32_0 = arith.constant 0 : i32
    %c0_i32_1 = arith.constant 0 : i32
    return %c0_i32, %c0_i32_0 : i32, i32
  }
  func.func @transform_11(%arg0: i32) -> (i32, i32) {
    %c0_i32 = arith.constant 0 : i32
    %c0_i32_0 = arith.constant 0 : i32
    %c0_i32_1 = arith.constant 0 : i32
    return %c0_i32, %c0_i32_0 : i32, i32
  }
  func.func @transform_12(%arg0: i32) -> (i32, i32) {
    %c0_i32 = arith.constant 0 : i32
    %c0_i32_0 = arith.constant 0 : i32
    %c0_i32_1 = arith.constant 0 : i32
    return %c0_i32, %c0_i32_0 : i32, i32
  }
  func.func @transform_13(%arg0: i32) -> (i32, i32, i32) {
    %c0_i32 = arith.constant 0 : i32
    %c0_i32_0 = arith.constant 0 : i32
    %c0_i32_1 = arith.constant 0 : i32
    return %arg0, %c0_i32, %c0_i32_0 : i32, i32, i32
  }
}

</mosaic_0001>

<bundles_post_ra>
// kernel: tpu_custom_call.1
= control target key start
LH: loop header
LB: loop body
LE: loop exit
PB: predicated region body
PF: predicated region fallthrough
CT: control target
= control target key end

     0   :  { %s2475_s0 = inlined_call_operand.vmem [shape: f32[2,8,32], index: 0, kind: input, shape index: {}]   ;;  %s2476_s1 = inlined_call_operand.vmem [shape: f32[1,32], index: 1, kind: input, shape index: {}]   ;;  %s2477_s2 = inlined_call_operand.vmem [shape: f32[1,32], index: 2, kind: input, shape index: {}]   ;;  %s2478_s3 = inlined_call_operand.vmem [shape: bf16[4,32,24], index: 3, kind: input, shape index: {}]   ;;  %s2479_s4 = inlined_call_operand.vmem [shape: f32[4,1,24], index: 4, kind: input, shape index: {}]   ;;  %s2480_s5 = inlined_call_operand.vmem [shape: bf16[4,8,32], index: 5, kind: input, shape index: {}]   ;;  %s2481_s6 = inlined_call_operand.vmem [shape: f32[1,32], index: 6, kind: input, shape index: {}]   ;;  %s2482_s7 = inlined_call_operand.vmem [shape: f32[1,32], index: 7, kind: input, shape index: {}]   ;;  %s2483_s8 = inlined_call_operand.vmem [shape: f32[1,32], index: 8, kind: input, shape index: {}]   ;;  %s2484_s9 = inlined_call_operand.vmem [shape: bf16[32,128], index: 9, kind: input, shape index: {}]   ;;  %s2485_s10 = inlined_call_operand.vmem [shape: f32[1,128], index: 10, kind: input, shape index: {}]   ;;  %s2486_s11 = inlined_call_operand.vmem [shape: bf16[128,32], index: 11, kind: input, shape index: {}]   ;;  %s2487_s12 = inlined_call_operand.vmem [shape: f32[1,32], index: 12, kind: input, shape index: {}]   ;;  %s2488_s13 = inlined_call_operand.hbm [shape: f32[2,8,32], index: 13, kind: output, shape index: {}]  }
   0x1   :  { %2489 = sst [smem:[#allocation5_spill]] %s2475_s0 }
   0x2   :  { %2490 = sst [smem:[#allocation6_spill]] %s2476_s1 }
   0x3   :  { %2491 = sst [smem:[#allocation7_spill]] %s2477_s2 }
   0x4   :  { %18 = vsyncpa [#allocation3], 0 }
   0x5   :  { %20 = vsyncpa [#allocation3 + $0x1], 0  ;;  %s2139_s25 = smov 0   ;;  %s2141_s26 = smov 0  }
   0x6   :  { %s2143_s27 = smov 0   ;;  %s2145_s28 = smov 0  }
   0x7 LB: > { %s2160_s29 = sadd.s32 4294967295, %s2061_s28   ;;  %s1681_s30 = sadd.s32 4294967294, %s2061_s28   ;;  %s2061_s28 = sphi %s2145_s28, %s2500_s28   ;;  %s2057_s27 = sphi %s2143_s27, %s2499_s27   ;;  %s2053_s26 = sphi %s2141_s26, %s2498_s26   ;;  %s2049_s25 = sphi %s2139_s25, %s2497_s25  }
   0x8   : > { %s2164_s14 = sadd.s32 1, %s2061_s28   ;;  %s311_s15 = sadd.s32 1, %s2057_s27 }
   0x9   : > { %s308_s16 = ssub.s32 %s2061_s28, %s2164_s14  ;;  %p321_p0 = scmp.ne.s32.totalorder %s2057_s27, %s2053_s26 }
   0xa   : > { %p309_p1 = scmp.eq.s32.totalorder %s308_s16, 0  ;;  %p322_p2 = scmp.eq.s32.totalorder %s2160_s29, 1 }
   0xb   : > { %p327_p3 = scmp.ne.s32.totalorder %s2053_s26, %s2049_s25  ;;  %p328_p4 = scmp.eq.s32.totalorder %s1681_s30, 1 }
   0xc   : > { %s2175_s17 = scalar_select %p309_p1, %s2057_s27, %s311_s15  }
   0xd   : > { %p2177_p5 = por %p322_p2, %p321_p0  ;;  %p2181_p6 = por %p328_p4, %p327_p3 }
   0xe   : > { %p1684_p7 = scmp.ge.s32.totalorder %s2061_s28, 1  ;;  %p389_p8 = scmp.lt.s32.totalorder %s2061_s28, 3 }
  0x10   : > { %p390_p9 = pnand %p1684_p7, %p389_p8 }
  0x11   : > { %p432_p10 = scmp.lt.s32.totalorder (!%p390_p9), %s2160_s29, 1  ;;  %s2494_s0 = sld [smem:[#allocation5_spill]] (!%p390_p9) }
  0x12   : > { %393 = sbr.rel (%p390_p9) target bundleno = 2212 (0x8a4), region = 72  ;;  %s2495_s1 = sld [smem:[#allocation6_spill]] (!%p390_p9) }
  0x13   : > { %s2496_s2 = sld [smem:[#allocation7_spill]] (!%p390_p9)  ;;  %s2065_s23 = smov (!%p390_p9), 120  }
  0x14   : > { %s2066_s22 = smov (!%p390_p9), 112   ;;  %s429_s16 = sand.u32 (!%p390_p9), 1, %s2053_s26  }
  0x17   : > { %s433_s20 = scalar_select %p432_p10, %s2160_s29, 1  ;;  %vm440_vm0 = vcmask 261120   ;;  %v1961_v7 = vld [vmem:[%s2478_s3 + $0x8] sm:$0xff]   ;;  %v1962_v8 = vld [vmem:[%s2478_s3 + $0x38] sm:$0xff]   ;;  %v2063_v9 = vmov 0.0   ;;  %v1963_v10 = vld [vmem:[%s2478_s3] sm:$0xff]  }
  0x18   : > { %1785 = vmatprep.subr.bf16.mxu0 %v2063_v9  ;;  %1809 = vmatprep.subr.bf16.mxu1 %v2063_v9  ;;  %v1964_v11 = vld [vmem:[%s2478_s3 + $0x30] sm:$0xff]   ;;  %vm2064_vm1 = vmmov 0   ;;  %v1687_v16 = vld [vmem:[%s2495_s1] ss:$0 sm:$0xff]  ;;  %v1965_v21 = vld [vmem:[%s2478_s3 + $0x18] sm:$0xff]   ;;  %vm746_vm2 = vcmask 64512  }
  0x19   : > { %s1686_s21 = sshll.u32 %s433_s20, 3  ;;  %1786 = vmatpush3.bf16.msra.mxu0 %v1961_v7  ;;  %1810 = vmatpush3.bf16.msra.mxu1 %v1962_v8  ;;  %v1688_v18 = vld [vmem:[%s2496_s2] ss:$0 sm:$0xff]  ;;  %v1966_v23 = vld [vmem:[%s2478_s3 + $0x10] sm:$0xff]   ;;  %v1967_v24 = vld [vmem:[%s2478_s3 + $0x28] sm:$0xff]   ;;  %vm989_vm3 = vcmask 1043456  }
  0x1a   : > { %s435_s24 = scalar_lea.vmem %s2494_s0, %s1686_s21  ;;  %1787 = vmatprep.subr.bf16.mxu0 %v2063_v9  ;;  %1811 = vmatprep.subr.bf16.mxu1 %v2063_v9  ;;  %v1968_v25 = vld [vmem:[%s2478_s3 + $0x20] sm:$0xff]   ;;  %s1685_s20 = sshll.u32 %s429_s16, 3 }
  0x1b   : > { %v2192_v0 = vld [vmem:[%s435_s24] sm:$0xff]  ;;  %1789 = vmatprep.mubr.msk.bf16.mxu0 %vm2064_vm1, %v2063_v9  ;;  %1813 = vmatprep.mubr.msk.bf16.mxu1 %vm2064_vm1, %v2063_v9  ;;  %s431_s24 = scalar_lea.vmem [#allocation2], %s1685_s20  ;;  %s2068_s21 = smov [#allocation2]  }
  0x1c   : > { %v441_v1 = vsel %vm440_vm0, %v2192_v0, 0.0  ;;  %v1689_v26 = vld [vmem:[%s2479_s4] ss:$0 sm:$0xff]  ;;  %v1690_v37 = vld [vmem:[%s2479_s4 + $0x1] ss:$0 sm:$0xff]  ;;  %s1622_s30 = sshll.u32 %s431_s24, 4  ;;  %s2435_s30 = int_to_ptr.vmem [resolvable:$true] %s1622_s30 }
  0x1d   : > { %442 = vadd.xlane.f32.xlu0 %v441_v1  ;;  %1788 = vmatpush3.bf16.msra.mxu0 %v1963_v10  ;;  %v1692_v38 = vld [vmem:[%s2479_s4 + $0x3] ss:$0 sm:$0xff]  ;;  %v1691_v46 = vld [vmem:[%s2479_s4 + $0x2] ss:$0 sm:$0xff]  ;;  %v737_v10 = vlaneseq  ;;  %s2001_s20 = scalar_lea.vmem %s2435_s30, 128 }
  0x1e   : > { %1812 = vmatpush3.bf16.msra.mxu1 %v1964_v11  ;;  %1793 = vmatprep.subr.bf16.mxu0 %v2063_v9  ;;  %p2002_p11 = scmp.ne.s32.totalorder %s2435_s30, %s2001_s20 }
  0x1f   : > { %1823 = vmatprep.subr.bf16.mxu1 %v2063_v9  ;;  %v738_v11 = vshrl.u32 %v737_v10, 7 }
  0x20   : > { %p2003_p12 = pnand %p2002_p11, %p2177_p5 }
  0x22   : > { %p2004_p13 = pneg %p2003_p12 }
  0xa6   : > { %v443_v2 = vpop.xlane.xlu0 %442 }
  0xa7   : > { %v445_v3 = vmul.f32 0.03125, %v443_v2 }
  0xa9   : > { %v446_v4 = vsub.f32 %v2192_v0, %v445_v3 }
  0xab   : > { %v447_v5 = vmul.f32 %v446_v4, %v446_v4 }
  0xad   : > { %v448_v6 = vsel %vm440_vm0, %v447_v5, 0.0 }
  0xae   : > { %449 = vadd.xlane.f32.xlu0 %v448_v6 }
 0x137   : > { %v450_v12 = vpop.xlane.xlu0 %449 }
 0x138   : > { %v451_v13 = vmul.f32 0.03125, %v450_v12  ;;  %v740_v12 = vand.u32 127, %v737_v10 }
 0x13a   : > { %v452_v14 = vadd.f32 1e-05, %v451_v13  ;;  %vm741_vm4 = vcmp.le.s32.totalorder %v740_v12, %v738_v11  ;;  %v2067_v13 = vmov -1e+30  }
 0x13c   : > { %1979 = vrsqrt.f32 %v452_v14  ;;  %v742_v14 = vsel %vm741_vm4, 0.0, %v2067_v13 }
 0x149   : > { %v1980_v15 = vpop.eup %1979 }
 0x14a   : > { %v454_v17 = vmul.f32 %v1980_v15, %v446_v4 }
 0x14c   : > { %v461_v19 = vmul.f32 %v1687_v16, %v454_v17 }
 0x14e   : > { %v468_v20 = vadd.f32 %v1688_v18, %v461_v19 }
 0x150   : > { %v469_v22 = vpack.c.bf16 %v468_v20, %v468_v20 }
 0x152   : > { %1790 = vmatmul.mubr.msk.bf16.vlgmr.msra.gmra.mxu0 %vm440_vm0, %v469_v22  ;;  %1814 = vmatmul.mubr.msk.bf16.vlgmr.msra.gmra.mxu1 %vm440_vm0, %v469_v22 }
 0x153   : > { %1794 = vmatpush3.bf16.msra.mxu0 %v1965_v21  ;;  %1797 = vmatprep.mubr.msk.bf16.mxu0 %vm2064_vm1, %v2063_v9 }
 0x154   : > { %1795 = vmatprep.subr.bf16.mxu0 %v2063_v9  ;;  %1825 = vmatprep.mubr.msk.bf16.mxu1 %vm2064_vm1, %v2063_v9 }
 0x157   : > { %1796 = vmatpush3.bf16.msra.mxu0 %v1966_v23 }
 0x158   : > { %1801 = vmatprep.subr.bf16.mxu0 %v2063_v9 }
 0x15a   : > { %1798 = vmatmul.mubr.msk.bf16.vlgmr.msra.gmra.mxu0 %vm440_vm0, %v469_v22 }
 0x15b   : > { %1802 = vmatpush3.bf16.msra.mxu0 %v1967_v24  ;;  %1805 = vmatprep.mubr.msk.bf16.mxu0 %vm2064_vm1, %v2063_v9 }
 0x15c   : > { %1803 = vmatprep.subr.bf16.mxu0 %v2063_v9 }
 0x15f   : > { %1804 = vmatpush3.bf16.msra.mxu0 %v1968_v25 }
 0x160   : > { %1817 = vmatprep.subr.bf16.mxu0 %v2063_v9 }
 0x162   : > { %1806 = vmatmul.mubr.msk.bf16.vlgmr.msra.gmra.mxu0 %vm440_vm0, %v469_v22 }
 0x163   : > { %1819 = vmatprep.mubr.msk.bf16.mxu0 %vm2064_vm1, %v2063_v9 }
 0x212   : > { %v563_v27 = vpop.f32.mrf.mxu0  ;;  %v719_v28 = vpop.f32.mrf.mxu1 }
 0x213   : > { %v564_v29 = vadd.f32 %v1689_v26, %v563_v27  ;;  %v720_v42 = vadd.f32 %v1692_v38, %v719_v28 }
 0x214   : > { %v1791_v30 = vpop.f32.mrf.mxu0  ;;  %v1815_v31 = vpop.f32.mrf.mxu1 }
 0x215   : > { %v733_v32 = vpack.c.bf16 %v564_v29, %v564_v29  ;;  %v2269_v47 = vpack.c.bf16 %v720_v42, %v720_v42  ;;  %v725_v56 = vmul.f32 0.35355338, %v564_v29  ;;  %v728_v3 = vmul.f32 0.35355338, %v720_v42 }
 0x216   : > { %v566_v33 = vpop.f32.mrf.mxu0  ;;  %v722_v34 = vpop.f32.mrf.mxu1 }
 0x217   : > { %744 = vrot.lane.b32.xlu1 %v733_v32, %s2065_s23  ;;  %v729_v57 = vpack.c.bf16 %v725_v56, %v725_v56  ;;  %v732_v6 = vpack.c.bf16 %v728_v3, %v728_v3 }
 0x218   : > { %v1792_v35 = vpop.f32.mrf.mxu0  ;;  %v1816_v36 = vpop.f32.mrf.mxu1 }
 0x21a   : > { %v615_v39 = vpop.f32.mrf.mxu0 }
 0x21b   : > { %v616_v40 = vadd.f32 %v1690_v37, %v615_v39 }
 0x21c   : > { %v1799_v41 = vpop.f32.mrf.mxu0 }
 0x21d   : > { %v2263_v43 = vpack.c.bf16 %v616_v40, %v616_v40  ;;  %v726_v60 = vmul.f32 0.35355338, %v616_v40 }
 0x21e   : > { %v618_v44 = vpop.f32.mrf.mxu0 }
 0x21f   : > { %794 = vrot.lane.b32.xlu1 %v2263_v43, %s2065_s23  ;;  %v730_v62 = vpack.c.bf16 %v726_v60, %v726_v60 }
 0x220   : > { %v1800_v45 = vpop.f32.mrf.mxu0 }
 0x222   : > { %v667_v48 = vpop.f32.mrf.mxu0 }
 0x223   : > { %v668_v49 = vadd.f32 %v1691_v46, %v667_v48  ;;  %892 = vrot.lane.b32.xlu1 %v2269_v47, %s2065_s23 }
 0x224   : > { %v1807_v50 = vpop.f32.mrf.mxu0 }
 0x225   : > { %v2272_v51 = vpack.c.bf16 %v668_v49, %v668_v49  ;;  %v727_v4 = vmul.f32 0.35355338, %v668_v49 }
 0x226   : > { %v670_v52 = vpop.f32.mrf.mxu0 }
 0x227   : > { %984 = vrot.lane.b32.xlu1 %v733_v32, %s2066_s22  ;;  %843 = vrot.lane.b32.xlu0 %v2272_v51, %s2065_s23  ;;  %v731_v7 = vpack.c.bf16 %v727_v4, %v727_v4  ;;  %s1734_s23 = sshll.u32 %s2160_s29, 7  ;;  %s1609_s29 = scalar_lea.sflag [#allocation3], %s429_s16 }
 0x228   : > { %v1808_v53 = vpop.f32.mrf.mxu0  ;;  %s2433_s1 = scalar_lea.hbm %s2488_s13, %s1734_s23 }
 0x289   : > { %v745_v54 = vpop.permute.xlu1 %744 }
 0x28a   : > { %v751_v55 = vsel %vm746_vm2, %v745_v54, 0 }
 0x28b   : > { %1818 = vmatpush3.bf16.xpose.msra.mxu0 %v751_v55 }
 0x28c   : > { %1829 = vmatprep.subr.bf16.mxu0 %v2063_v9 }
 0x291   : > { %v795_v58 = vpop.permute.xlu1 %794 }
 0x292   : > { %v800_v59 = vsel %vm746_vm2, %v795_v58, 0  ;;  %1820 = vmatmul.mubr.msk.bf16.vlgmr.msra.gmra.mxu0 %vm746_vm2, %v729_v57 }
 0x293   : > { %1824 = vmatpush3.bf16.xpose.msra.mxu1 %v800_v59  ;;  %1831 = vmatprep.mubr.msk.bf16.mxu0 %vm2064_vm1, %v2063_v9 }
 0x294   : > { %1835 = vmatprep.subr.bf16.mxu1 %v2063_v9 }
 0x295   : > { %v893_v61 = vpop.permute.xlu1 %892 }
 0x296   : > { %v898_v1 = vsel %vm746_vm2, %v893_v61, 0 }
 0x299   : > { %v844_v63 = vpop.permute.xlu0 %843  ;;  %v985_v5 = vpop.permute.xlu1 %984 }
 0x29a   : > { %v849_v2 = vsel %vm746_vm2, %v844_v63, 0  ;;  %1826 = vmatmul.mubr.msk.bf16.vlgmr.msra.gmra.mxu1 %vm746_vm2, %v730_v62  ;;  %v991_v8 = vsel %vm989_vm3, %v985_v5, 0 }
 0x29b   : > { %1830 = vmatpush3.bf16.xpose.msra.mxu0 %v849_v2  ;;  %1836 = vmatpush3.bf16.xpose.msra.mxu1 %v898_v1 }
 0x29c   : > { %1837 = vmatprep.mubr.msk.bf16.mxu1 %vm2064_vm1, %v2063_v9  ;;  %1841 = vmatprep.subr.bf16.mxu0 %v2063_v9 }
 0x29d   : > { %1847 = vmatprep.subr.bf16.mxu1 %v2063_v9 }
 0x2a2   : > { %1832 = vmatmul.mubr.msk.bf16.vlgmr.msra.gmra.mxu0 %vm746_vm2, %v731_v7  ;;  %1838 = vmatmul.mubr.msk.bf16.vlgmr.msra.gmra.mxu1 %vm746_vm2, %v732_v6  ;;  %v1185_v6 = vld [vmem:[%s2480_s5] sm:$0xf] }
 0x2a3   : > { %1842 = vmatpush3.bf16.msra.mxu0 %v991_v8  ;;  %1843 = vmatprep.mubr.msk.bf16.mxu0 %vm2064_vm1, %v2063_v9  ;;  %v1193_v7 = vsel %vm989_vm3, %v1185_v6, 0  ;;  %v1186_v8 = vld [vmem:[%s2480_s5 + $0x4] sm:$0xf] }
 0x2a4   : > { %1853 = vmatprep.subr.bf16.mxu0 %v2063_v9  ;;  %1849 = vmatprep.mubr.msk.bf16.mxu1 %vm2064_vm1, %v2063_v9  ;;  %v1239_v10 = vsel %vm989_vm3, %v1186_v8, 0 }
 0x352   : > { %v787_v15 = vpop.f32.mrf.mxu0 }
 0x353   : > { %v788_v16 = vadd.f32 %v787_v15, %v742_v14  ;;  %v1187_v15 = vld [vmem:[%s2480_s5 + $0x8] sm:$0xf] }
 0x354   : > { %v1821_v17 = vpop.f32.mrf.mxu0 }
 0x355   : > { %v940_v18 = vsel %vm746_vm2, %v788_v16, -inf }
 0x356   : > { %941 = vmax.xlane.f32.xlu1 %v940_v18  ;;  %v790_v19 = vpop.f32.mrf.mxu0 }
 0x357   : > { %v1285_v19 = vsel %vm989_vm3, %v1187_v15, 0 }
 0x358   : > { %v1822_v20 = vpop.f32.mrf.mxu0 }
 0x35a   : > { %v836_v21 = vpop.f32.mrf.mxu1 }
 0x35b   : > { %v837_v22 = vadd.f32 %v836_v21, %v742_v14 }
 0x35c   : > { %v1827_v23 = vpop.f32.mrf.mxu1 }
 0x35d   : > { %v943_v24 = vsel %vm746_vm2, %v837_v22, -inf }
 0x35e   : > { %v839_v25 = vpop.f32.mrf.mxu1  ;;  %944 = vmax.xlane.f32.xlu0 %v943_v24  ;;  %v1188_v24 = vld [vmem:[%s2480_s5 + $0xc] sm:$0xf] }
 0x360   : > { %v1828_v26 = vpop.f32.mrf.mxu1 }
 0x362   : > { %v885_v27 = vpop.f32.mrf.mxu0  ;;  %v934_v28 = vpop.f32.mrf.mxu1 }
 0x363   : > { %v886_v35 = vadd.f32 %v885_v27, %v742_v14  ;;  %v935_v36 = vadd.f32 %v934_v28, %v742_v14  ;;  %v1331_v28 = vsel %vm989_vm3, %v1188_v24, 0  ;;  %v1719_v24 = vld [vmem:[%s2483_s8] ss:$0 sm:$0xff] }
 0x364   : > { %v1833_v29 = vpop.f32.mrf.mxu0  ;;  %v1839_v30 = vpop.f32.mrf.mxu1 }
 0x365   : > { %v946_v37 = vsel %vm746_vm2, %v886_v35, -inf  ;;  %v949_v38 = vsel %vm746_vm2, %v935_v36, -inf }
 0x366   : > { %v888_v31 = vpop.f32.mrf.mxu0  ;;  %v937_v32 = vpop.f32.mrf.mxu1 }
 0x367   : > { %1081 = vrot.lane.b32.xlu1 %v2272_v51, %s2066_s22 }
 0x368   : > { %v1834_v33 = vpop.f32.mrf.mxu0  ;;  %v1840_v34 = vpop.f32.mrf.mxu1 }
 0x374   : > { %1033 = vrot.lane.b32.xlu0 %v2263_v43, %s2066_s22 }
 0x38b   : > { %947 = vmax.xlane.f32.xlu1 %v946_v37 }
 0x38f   : > { %950 = vmax.xlane.f32.xlu1 %v949_v38 }
 0x3a0   : > { %1129 = vrot.lane.b32.xlu1 %v2269_v47, %s2066_s22  ;;  %s2005_s22 = sshll.u32 %s2068_s21, 4  ;;  %s2006_s22 = int_to_ptr.vmem [resolvable:$false] %s2005_s22 }
 0x3a1   : > { %s2007_s0 = scalar_lea.vmem %s2006_s22, 256  ;;  %p2008_p0 = scmp.lt.s32.totalorder %s2435_s30, %s2006_s22 }
 0x3a2   : > { %p2009_p1 = scmp.lt.s32.totalorder %s2007_s0, %s2001_s20 }
 0x3a4   : > { %p2010_p2 = por %p2009_p1, %p2008_p0 }
 0x3a6   : > { %p2011_p3 = pnand %p2010_p2, %p2004_p13 }
 0x3df   : > { %v942_v39 = vpop.xlane.xlu1 %941 }
 0x3e0   : > { %v952_v40 = vsub.f32 %v788_v16, %v942_v39 }
 0x3e2   : > { %v956_v41 = vmul.f32 1.442695, %v952_v40 }
 0x3e3   : > { %v1082_v49 = vpop.permute.xlu1 %1081 }
 0x3e4   : > { %1981 = vpow2.f32 %v956_v41  ;;  %v1087_v47 = vsel %vm989_vm3, %v1082_v49, 0 }
 0x3e7   : > { %v945_v42 = vpop.xlane.xlu0 %944 }
 0x3e8   : > { %v953_v44 = vsub.f32 %v837_v22, %v945_v42 }
 0x3ea   : > { %v958_v45 = vmul.f32 1.442695, %v953_v44 }
 0x3eb   : > { %v1034_v46 = vpop.permute.xlu0 %1033 }
 0x3ec   : > { %1983 = vpow2.f32 %v958_v45  ;;  %v1039_v43 = vsel %vm989_vm3, %v1034_v46, 0 }
 0x3ed   : > { %1848 = vmatpush3.bf16.msra.mxu1 %v1039_v43 }
 0x3ee   : > { %1859 = vmatprep.subr.bf16.mxu1 %v2063_v9 }
 0x3f1   : > { %v1982_v48 = vpop.eup %1981 }
 0x3f2   : > { %v964_v50 = vsel %vm746_vm2, %v1982_v48, 0.0  ;;  %v980_v51 = vpack.c.bf16 %v1982_v48, %v1982_v48 }
 0x3f3   : > { %965 = vadd.xlane.f32.xlu1 %v964_v50 }
 0x3f4   : > { %1844 = vmatmul.mubr.msk.bf16.vlgmr.msra.gmra.mxu0 %vm746_vm2, %v980_v51 }
 0x3f5   : > { %1854 = vmatpush3.bf16.msra.mxu0 %v1087_v47  ;;  %1855 = vmatprep.mubr.msk.bf16.mxu0 %vm2064_vm1, %v2063_v9 }
 0x3f6   : > { %1865 = vmatprep.subr.bf16.mxu0 %v2063_v9 }
 0x3f9   : > { %v1984_v52 = vpop.eup %1983 }
 0x3fa   : > { %v967_v53 = vsel %vm746_vm2, %v1984_v52, 0.0  ;;  %v981_v54 = vpack.c.bf16 %v1984_v52, %v1984_v52 }
 0x3fb   : > { %968 = vadd.xlane.f32.xlu0 %v967_v53 }
 0x3fc   : > { %1850 = vmatmul.mubr.msk.bf16.vlgmr.msra.gmra.mxu1 %vm746_vm2, %v981_v54 }
 0x3fd   : > { %1861 = vmatprep.mubr.msk.bf16.mxu1 %vm2064_vm1, %v2063_v9 }
 0x414   : > { %v948_v55 = vpop.xlane.xlu1 %947 }
 0x415   : > { %v954_v56 = vsub.f32 %v886_v35, %v948_v55 }
 0x417   : > { %v960_v57 = vmul.f32 1.442695, %v954_v56 }
 0x418   : > { %v951_v58 = vpop.xlane.xlu1 %950 }
 0x419   : > { %1985 = vpow2.f32 %v960_v57  ;;  %v955_v59 = vsub.f32 %v935_v36, %v951_v58 }
 0x41b   : > { %v962_v60 = vmul.f32 1.442695, %v955_v59 }
 0x41c   : > { %v1130_v61 = vpop.permute.xlu1 %1129 }
 0x41d   : > { %1987 = vpow2.f32 %v962_v60  ;;  %v1135_v62 = vsel %vm989_vm3, %v1130_v61, 0 }
 0x41e   : > { %1860 = vmatpush3.bf16.msra.mxu1 %v1135_v62 }
 0x41f   : > { %1871 = vmatprep.subr.bf16.mxu1 %v2063_v9 }
 0x426   : > { %v1986_v63 = vpop.eup %1985 }
 0x427   : > { %v970_v1 = vsel %vm746_vm2, %v1986_v63, 0.0  ;;  %v982_v2 = vpack.c.bf16 %v1986_v63, %v1986_v63 }
 0x428   : > { %971 = vadd.xlane.f32.xlu0 %v970_v1 }
 0x429   : > { %1856 = vmatmul.mubr.msk.bf16.vlgmr.msra.gmra.mxu0 %vm746_vm2, %v982_v2  ;;  %v1717_v2 = vld [vmem:[%s2481_s6] ss:$0 sm:$0xff] }
 0x42a   : > { %v1988_v3 = vpop.eup %1987  ;;  %1867 = vmatprep.mubr.msk.bf16.mxu0 %vm2064_vm1, %v2063_v9  ;;  %1866 = vmatpush3.bf16.msra.mxu0 %v1193_v7 }
 0x42b   : > { %v973_v4 = vsel %vm746_vm2, %v1988_v3, 0.0  ;;  %v983_v5 = vpack.c.bf16 %v1988_v3, %v1988_v3  ;;  %1877 = vmatprep.subr.bf16.mxu0 %v2063_v9 }
 0x42c   : > { %974 = vadd.xlane.f32.xlu1 %v973_v4 }
 0x42d   : > { %1862 = vmatmul.mubr.msk.bf16.vlgmr.msra.gmra.mxu1 %vm746_vm2, %v983_v5 }
 0x42e   : > { %1873 = vmatprep.mubr.msk.bf16.mxu1 %vm2064_vm1, %v2063_v9  ;;  %1872 = vmatpush3.bf16.msra.mxu1 %v1239_v10 }
 0x42f   : > { %1883 = vmatprep.subr.bf16.mxu1 %v2063_v9 }
 0x47c   : > { %v966_v11 = vpop.xlane.xlu1 %965 }
 0x47d   : > { %1989 = vrcp.f32 %v966_v11 }
 0x484   : > { %v969_v12 = vpop.xlane.xlu0 %968 }
 0x485   : > { %1991 = vrcp.f32 %v969_v12 }
 0x48a   : > { %v1990_v13 = vpop.eup %1989 }
 0x492   : > { %v1992_v22 = vpop.eup %1991 }
 0x4b1   : > { %v972_v31 = vpop.xlane.xlu0 %971 }
 0x4b2   : > { %1993 = vrcp.f32 %v972_v31  ;;  %v1974_v31 = vld [vmem:[%s2486_s11 + $0x20] sm:$0xff]  }
 0x4b4   : > { %v1027_v14 = vpop.f32.mrf.mxu0 }
 0x4b5   : > { %v1177_v16 = vmul.f32 %v1990_v13, %v1027_v14  ;;  %v975_v32 = vpop.xlane.xlu1 %974 }
 0x4b6   : > { %v1845_v17 = vpop.f32.mrf.mxu0  ;;  %1995 = vrcp.f32 %v975_v32  ;;  %v1975_v32 = vld [vmem:[%s2486_s11 + $0x18] sm:$0xff]  }
 0x4b7   : > { %v1181_v18 = vpack.c.bf16 %v1177_v16, %v1177_v16  ;;  %v1969_v17 = vld [vmem:[%s2484_s9 + $0x8] sm:$0xff]  }
 0x4b8   : > { %v1030_v20 = vpop.f32.mrf.mxu0 }
 0x4b9   : > { %1868 = vmatmul.mubr.msk.bf16.vlgmr.msra.gmra.mxu0 %vm746_vm2, %v1181_v18 }
 0x4ba   : > { %v1846_v21 = vpop.f32.mrf.mxu0  ;;  %1878 = vmatpush3.bf16.msra.mxu0 %v1285_v19  ;;  %1879 = vmatprep.mubr.msk.bf16.mxu0 %vm2064_vm1, %v2063_v9 }
 0x4bb   : > { %1889 = vmatprep.subr.bf16.mxu0 %v2063_v9 }
 0x4bc   : > { %v1075_v23 = vpop.f32.mrf.mxu1 }
 0x4bd   : > { %v1178_v25 = vmul.f32 %v1992_v22, %v1075_v23  ;;  %v1718_v22 = vld [vmem:[%s2482_s7] ss:$0 sm:$0xff] }
 0x4be   : > { %v1851_v26 = vpop.f32.mrf.mxu1 }
 0x4bf   : > { %v1182_v27 = vpack.c.bf16 %v1178_v25, %v1178_v25  ;;  %v1994_v33 = vpop.eup %1993 }
 0x4c0   : > { %v1078_v29 = vpop.f32.mrf.mxu1 }
 0x4c1   : > { %1874 = vmatmul.mubr.msk.bf16.vlgmr.msra.gmra.mxu1 %vm746_vm2, %v1182_v27  ;;  %v1972_v29 = vld [vmem:[%s2486_s11 + $0x30] sm:$0xff]  }
 0x4c2   : > { %v1852_v30 = vpop.f32.mrf.mxu1  ;;  %1884 = vmatpush3.bf16.msra.mxu1 %v1331_v28  ;;  %1885 = vmatprep.mubr.msk.bf16.mxu1 %vm2064_vm1, %v2063_v9  ;;  %v1971_v28 = vld [vmem:[%s2486_s11 + $0x38] sm:$0xff]  }
 0x4c3   : > { %1897 = vmatprep.subr.bf16.mxu1 %v2063_v9  ;;  %v1996_v38 = vpop.eup %1995  ;;  %v1973_v30 = vld [vmem:[%s2486_s11 + $0x28] sm:$0xff]  }
 0x4e9   : > { %v1123_v34 = vpop.f32.mrf.mxu0 }
 0x4ea   : > { %v1179_v35 = vmul.f32 %v1994_v33, %v1123_v34  ;;  %v1976_v33 = vld [vmem:[%s2486_s11 + $0x10] sm:$0xff]   ;;  %v1977_v34 = vld [vmem:[%s2486_s11 + $0x8] sm:$0xff]  }
 0x4eb   : > { %v1857_v36 = vpop.f32.mrf.mxu0 }
 0x4ec   : > { %v1183_v37 = vpack.c.bf16 %v1179_v35, %v1179_v35  ;;  %v1978_v35 = vld [vmem:[%s2486_s11] sm:$0xff]  }
 0x4ed   : > { %v1126_v39 = vpop.f32.mrf.mxu0  ;;  %v1171_v40 = vpop.f32.mrf.mxu1  ;;  %v1720_v36 = vld [vmem:[%s2485_s10] ss:$0 sm:$0xff] }
 0x4ee   : > { %v1180_v41 = vmul.f32 %v1996_v38, %v1171_v40  ;;  %1880 = vmatmul.mubr.msk.bf16.vlgmr.msra.gmra.mxu0 %vm746_vm2, %v1183_v37 }
 0x4ef   : > { %v1858_v42 = vpop.f32.mrf.mxu0  ;;  %v1863_v44 = vpop.f32.mrf.mxu1  ;;  %1893 = vmatprep.mubr.msk.bf16.mxu0 %vm2064_vm1, %v2063_v9  ;;  %1890 = vmatpush3.bf16.msra.mxu0 %v1969_v17 }
 0x4f0   : > { %v1184_v45 = vpack.c.bf16 %v1180_v41, %v1180_v41  ;;  %1891 = vmatprep.subr.bf16.mxu0 %v2063_v9 }
 0x4f1   : > { %v1174_v46 = vpop.f32.mrf.mxu1 }
 0x4f2   : > { %1886 = vmatmul.mubr.msk.bf16.vlgmr.msra.gmra.mxu1 %vm746_vm2, %v1184_v45 }
 0x4f3   : > { %v1864_v43 = vpop.f32.mrf.mxu1  ;;  %1913 = vmatprep.mubr.msk.bf16.mxu1 %vm2064_vm1, %v2063_v9  ;;  %1898 = vmatpush3.bf16.msra.mxu1 %v1971_v28 }
 0x4f4   : > { %1899 = vmatprep.subr.bf16.mxu1 %v2063_v9 }
 0x4f7   : > { %1900 = vmatpush3.bf16.msra.mxu1 %v1972_v29 }
 0x4f8   : > { %1901 = vmatprep.subr.bf16.mxu1 %v2063_v9 }
 0x4fb   : > { %1902 = vmatpush3.bf16.msra.mxu1 %v1973_v30 }
 0x4fc   : > { %1903 = vmatprep.subr.bf16.mxu1 %v2063_v9 }
 0x4ff   : > { %1904 = vmatpush3.bf16.msra.mxu1 %v1974_v31 }
 0x500   : > { %1905 = vmatprep.subr.bf16.mxu1 %v2063_v9 }
 0x503   : > { %1906 = vmatpush3.bf16.msra.mxu1 %v1975_v32 }
 0x504   : > { %1907 = vmatprep.subr.bf16.mxu1 %v2063_v9 }
 0x507   : > { %1908 = vmatpush3.bf16.msra.mxu1 %v1976_v33 }
 0x508   : > { %1909 = vmatprep.subr.bf16.mxu1 %v2063_v9 }
 0x50b   : > { %1910 = vmatpush3.bf16.msra.mxu1 %v1977_v34 }
 0x50c   : > { %1911 = vmatprep.subr.bf16.mxu1 %v2063_v9 }
 0x50f   : > { %1912 = vmatpush3.bf16.msra.mxu1 %v1978_v35 }
 0x579   : > { %v1229_v48 = vpop.f32.mrf.mxu0 }
 0x57a   : > { %v1373_v57 = vsel %vm440_vm0, %v1229_v48, 0.0 }
 0x57b   : > { %v1869_v49 = vpop.f32.mrf.mxu0 }
 0x57d   : > { %v1232_v50 = vpop.f32.mrf.mxu0 }
 0x57f   : > { %v1870_v51 = vpop.f32.mrf.mxu0 }
 0x581   : > { %v1275_v47 = vpop.f32.mrf.mxu1 }
 0x582   : > { %v1374_v55 = vsel %vm440_vm0, %v1275_v47, 0.0  ;;  %v1724_v47 = vld [vmem:[%s2487_s12] ss:$0 sm:$0xff] }
 0x583   : > { %v1875_v52 = vpop.f32.mrf.mxu1  ;;  %v1375_v59 = vadd.f32 %v1374_v55, %v1373_v57 }
 0x585   : > { %v1278_v53 = vpop.f32.mrf.mxu1 }
 0x587   : > { %v1876_v54 = vpop.f32.mrf.mxu1 }
 0x5ae   : > { %v1321_v56 = vpop.f32.mrf.mxu0 }
 0x5af   : > { %v1376_v58 = vsel %vm440_vm0, %v1321_v56, 0.0 }
 0x5b0   : > { %v1881_v60 = vpop.f32.mrf.mxu0  ;;  %v1377_v61 = vadd.f32 %v1376_v58, %v1375_v59 }
 0x5b2   : > { %v1324_v62 = vpop.f32.mrf.mxu0  ;;  %v1367_v63 = vpop.f32.mrf.mxu1 }
 0x5b3   : > { %v1378_v1 = vsel %vm440_vm0, %v1367_v63, 0.0 }
 0x5b4   : > { %v1379_v3 = vadd.f32 %v1378_v1, %v1377_v61  ;;  %v1882_v4 = vpop.f32.mrf.mxu0  ;;  %v1887_v5 = vpop.f32.mrf.mxu1 }
 0x5b6   : > { %v1387_v6 = vadd.f32 %v1717_v2, %v1379_v3  ;;  %v1370_v7 = vpop.f32.mrf.mxu1 }
 0x5b8   : > { %v1888_v8 = vpop.f32.mrf.mxu1  ;;  %v2370_v10 = vadd.f32 %v1387_v6, %v2192_v0  ;;  %v1970_v0 = vld [vmem:[%s2484_s9] sm:$0xff]  }
 0x5b9   : > { %1892 = vmatpush3.bf16.msra.mxu0 %v1970_v0 }
 0x5ba   : > { %v1391_v11 = vsel %vm440_vm0, %v2370_v10, 0.0 }
 0x5bb   : > { %1392 = vadd.xlane.f32.xlu0 %v1391_v11 }
 0x644   : > { %v1393_v12 = vpop.xlane.xlu0 %1392 }
 0x645   : > { %v1394_v13 = vmul.f32 0.03125, %v1393_v12 }
 0x647   : > { %v1395_v14 = vsub.f32 %v2370_v10, %v1394_v13 }
 0x649   : > { %v1396_v15 = vmul.f32 %v1395_v14, %v1395_v14 }
 0x64b   : > { %v1397_v16 = vsel %vm440_vm0, %v1396_v15, 0.0 }
 0x64c   : > { %1398 = vadd.xlane.f32.xlu1 %v1397_v16 }
 0x6d5   : > { %v1399_v18 = vpop.xlane.xlu1 %1398 }
 0x6d6   : > { %v1400_v19 = vmul.f32 0.03125, %v1399_v18 }
 0x6d8   : > { %v1401_v20 = vadd.f32 1e-05, %v1400_v19 }
 0x6da   : > { %1997 = vrsqrt.f32 %v1401_v20 }
 0x6e7   : > { %v1998_v21 = vpop.eup %1997 }
 0x6e8   : > { %v1403_v23 = vmul.f32 %v1998_v21, %v1395_v14 }
 0x6ea   : > { %v1410_v25 = vmul.f32 %v1718_v22, %v1403_v23 }
 0x6ec   : > { %v1417_v26 = vadd.f32 %v1719_v24, %v1410_v25 }
 0x6ee   : > { %v1418_v27 = vpack.c.bf16 %v1417_v26, %v1417_v26 }
 0x6f0   : > { %1894 = vmatmul.mubr.msk.bf16.vlgmr.msra.gmra.mxu0 %vm440_vm0, %v1418_v27 }
 0x7b0   : > { %v1479_v37 = vpop.f32.mrf.mxu0 }
 0x7b1   : > { %v1480_v38 = vadd.f32 %v1720_v36, %v1479_v37 }
 0x7b2   : > { %v1895_v39 = vpop.f32.mrf.mxu0 }
 0x7b3   : > { %v1486_v40 = vmul.f32 0.044715, %v1480_v38  ;;  %v1485_v9 = vmul.f32 0.5, %v1480_v38 }
 0x7b4   : > { %v1482_v41 = vpop.f32.mrf.mxu0 }
 0x7b5   : > { %v1487_v42 = vmul.f32 %v1486_v40, %v1480_v38 }
 0x7b6   : > { %v1896_v44 = vpop.f32.mrf.mxu0 }
 0x7b7   : > { %v1488_v45 = vmul.f32 %v1487_v42, %v1480_v38 }
 0x7b9   : > { %v1489_v46 = vadd.f32 %v1488_v45, %v1480_v38 }
 0x7bb   : > { %v1490_v43 = vmul.f32 0.7978846, %v1489_v46 }
 0x7bd   : > { %1999 = vtanh.f32 %v1490_v43 }
 0x7ca   : > { %v2000_v48 = vpop.eup %1999 }
 0x7cb   : > { %v1492_v49 = vadd.f32 1.0, %v2000_v48 }
 0x7cd   : > { %v1493_v50 = vmul.f32 %v1492_v49, %v1485_v9 }
 0x7cf   : > { %v1494_v51 = vpack.c.bf16 %v1493_v50, %v1493_v50 }
 0x7d1   : > { %1914 = vmatmul.mubr.bf16.vlgmr.msra.gmra.mxu1 %v1494_v51 }
 0x891   : > { %v1600_v52 = vpop.f32.mrf.mxu1 }
 0x892   : > { %v1601_v53 = vadd.f32 %v1724_v47, %v1600_v52 }
 0x893   : > { %v1915_v54 = vpop.f32.mrf.mxu1 }
 0x894   : > { %v1606_v55 = vadd.f32 %v1601_v53, %v2370_v10 }
 0x895   : > { %v1603_v56 = vpop.f32.mrf.mxu1 }
 0x896   : > { %1607 = vst.msk [vmem:[%s431_s24] sm:$0xff] %vm440_vm0, %v1606_v55 }
 0x897   : > { %v1916_v57 = vpop.f32.mrf.mxu1 }
 0x898   : > { %2014 = shalt.err (!%p2011_p3)
}
 0x899   : > { %s2015_s23 = scalar_lea.hbm %s2433_s1, 128  ;;  %s2019_s15 = scalar_lea.hbm %s2488_s13, 256 }
 0x89a   : > { %p2016_p4 = scmp.ne.s32.totalorder %s2433_s1, %s2015_s23  ;;  %p2020_p9 = scmp.lt.s32.totalorder %s2433_s1, %s2488_s13 }
 0x89b   : > { %p2021_p10 = scmp.lt.s32.totalorder %s2019_s15, %s2015_s23 }
 0x89c   : > { %p2017_p7 = pnand %p2016_p4, %p2177_p5 }
 0x89d   : > { %p2022_p11 = por %p2021_p10, %p2020_p9 }
 0x89e   : > { %p2018_p8 = pneg %p2017_p7 }
 0x8a0   : > { %p2023_p12 = pnand %p2022_p11, %p2018_p8 }
 0x8a2   : > { %2026 = shalt.err (!%p2023_p12)
}
 0x8a3   : > { %1917 = dma.vmem_to_hbm [thread:$0]  (%p2177_p5), %s2435_s30, 128, %s2433_s1, %s1609_s29  }
 0x8a4 PF: > { %p1923_p13 = scmp.ge.s32.totalorder %s2061_s28, 2  ;;  %s1634_s20 = sand.u32 1, %s2049_s25  }
 0x8a5   : > { %s1635_s2 = scalar_lea.sflag [#allocation3], %s1634_s20 }
 0x8a6   : > { %p1920_p0 = pnand %p1923_p13, %p2181_p6 }
 0x8a8   : > { %p1921_p1 = pneg %p1920_p0 }
 0x8aa   : > { %2044 = dma.done.wait (%p1921_p1), %s1635_s2, 128  }
 0x8ab   : > { %2046 = vsyncadd (%p1921_p1), %s1635_s2, 4294967168  ;;  %p23_p2 = scmp.ge.s32.totalorder %s2164_s14, 4   ;;  %s2497_s25 = smov %s2053_s26 }
 0x8ac   : > { %s2498_s26 = smov %s2057_s27  ;;  %s2499_s27 = smov %s2175_s17 }
 0x8ad   : > { %s2500_s28 = smov %s2164_s14  ;;  %25 = sbr.rel (!%p23_p2) target bundleno = 7 (0x7), region = 107 }
 0x8b2   :  { %1640 = vsyncpa [#allocation3], 1 }
 0x8b3   :  { %1642 = vsyncpa [#allocation3 + $0x1], 1 }

</bundles_post_ra>
